<compile_context>
chip_gen: v7x
topology: tpu7x:2x2x1
jax: 0.10.0
libtpu: 0.0.40
codegen_flags: <defaults>
</compile_context>

<pallas_src>
import numpy as np
import jax
import jax.numpy as jnp
from jax.experimental import pallas as pl
from jax.experimental.pallas import tpu as pltpu

# ---- model hyper-parameters (small, consistent with the module) -------------
B = 2                  # batch
L = 16                 # sequence length
NUM_CATEGORIES = 16
EMB = 8
CIN = EMB + 1          # embedding_dim + 1 (surface availability channel)
C1, C2, C3 = 16, 32, 32
K = 3                  # kernel_size (odd -> "same" conv)
PAD = K // 2
NUM_CLASSES = 4
P1 = L // 2            # after pool1
P2 = L // 4            # after pool2

F32 = jnp.float32
BF16 = jnp.bfloat16

# ---------------------- packed parameter slab layout --------------------------
# Every parameter lives in one (SLAB_ROWS, 128) bf16 array; each block starts at
# a 16-row-aligned offset (bf16 sublane-packed tiles). Conv weights are stored
# tap-major: rows [t*Cin .. (t+1)*Cin) hold the tap-t matrix.
_PARAM_SHAPES = {
    "emb": (NUM_CATEGORIES, EMB),                 # embedding table
    "w1m": (K * CIN, C1), "b1": (1, C1),          # conv1 (merged taps)
    "w2m": (K * C1, C2),  "b2": (1, C2),          # conv2 (merged taps)
    "w3m": (K * C2, C3),  "b3": (1, C3),          # conv3 (merged taps)
    "wa1": (C3, C3 // 2), "ba1": (1, C3 // 2),    # attention linear 1
    "wa2": (C3 // 2, 1),  "ba2": (1, 1),          # attention linear 2
    "wfc": (C3, NUM_CLASSES), "bfc": (1, NUM_CLASSES),   # fc1
    "seg": (B, B * P2),                           # per-batch segment indicator
}


def _round16(n):
    return ((n + 15) // 16) * 16


def _layout():
    off, offs = 0, {}
    for name, (r, _) in _PARAM_SHAPES.items():
        offs[name] = off
        off += _round16(r)
    return offs, _round16(off)


SLAB_OFF, SLAB_ROWS = _layout()
SLAB_LANES = 128


def pack_params(p):
    """Host-side (numpy) one-time packing -> NO per-call XLA update-slice ops."""
    entries = {
        "emb": np.asarray(p["emb"], np.float32),
        "w1m": np.asarray(p["w1"], np.float32).reshape(K * CIN, C1),
        "b1":  np.asarray(p["b1"], np.float32),
        "w2m": np.asarray(p["w2"], np.float32).reshape(K * C1, C2),
        "b2":  np.asarray(p["b2"], np.float32),
        "w3m": np.asarray(p["w3"], np.float32).reshape(K * C2, C3),
        "b3":  np.asarray(p["b3"], np.float32),
        "wa1": np.asarray(p["wa1"], np.float32), "ba1": np.asarray(p["ba1"], np.float32),
        "wa2": np.asarray(p["wa2"], np.float32), "ba2": np.asarray(p["ba2"], np.float32),
        "wfc": np.asarray(p["wfc"], np.float32), "bfc": np.asarray(p["bfc"], np.float32),
        "seg": np.kron(np.eye(B, dtype=np.float32), np.ones((1, P2), np.float32)),
    }
    slab = np.zeros((SLAB_ROWS, SLAB_LANES), np.float32)
    for name, val in entries.items():
        r, c = _PARAM_SHAPES[name]
        o = SLAB_OFF[name]
        slab[o:o + r, 0:c] = val
    return jnp.asarray(slab, dtype=BF16)


def _ld(p_ref, name):
    r, c = _PARAM_SHAPES[name]
    o = SLAB_OFF[name]
    return p_ref[o:o + r, 0:c]


# ---------------------------- Pallas kernel ----------------------------------
def cnn3l_kernel(tok_ref, surf_ref, p_ref, out_ref, ls1, h1s, ls2, h2s, ls3):
    # zero the im2col LHS scratches once; only interiors are overwritten below,
    # so the untouched rows/lanes provide the "same"-conv zero padding.
    ls1[...] = jnp.zeros_like(ls1)
    ls2[...] = jnp.zeros_like(ls2)
    ls3[...] = jnp.zeros_like(ls3)

    # ---- embedding gather (one-hot matmul) + surface-availability channel ----
    cat = jax.lax.broadcasted_iota(jnp.int32, (B * L, NUM_CATEGORIES), 1)
    onehot = jnp.where(tok_ref[...] == cat, 1.0, 0.0).astype(BF16)        # (32,16)
    emb = jnp.dot(onehot, _ld(p_ref, "emb"), preferred_element_type=F32)  # (32, 8)
    x = jnp.concatenate([emb, surf_ref[...]], axis=-1)                    # (32, 9)

    # ---- conv1: merged-tap im2col LHS (batch folded into M) ----
    ls1[:, CIN:2 * CIN] = x                                   # tap 1: x[i]
    for b in range(B):
        r = b * L
        ls1[r + 1:r + L, 0:CIN] = x[r:r + L - 1, :]           # tap 0: x[i-1]
        ls1[r:r + L - 1, 2 * CIN:3 * CIN] = x[r + 1:r + L, :]  # tap 2: x[i+1]
    h1s[...] = jnp.maximum(
        jnp.dot(ls1[...].astype(BF16), _ld(p_ref, "w1m"),
                preferred_element_type=F32) + _ld(p_ref, "b1"), 0.0)      # (32,16)

    # ---- pool1 (k=2, s=2): strided even/odd sublane reads + max ----
    p1 = jnp.maximum(h1s[pl.ds(0, B * P1, stride=2), :],
                     h1s[pl.ds(1, B * P1, stride=2), :])                  # (16,16)
    # dropout(p=0.3) -> identity (eval mode)

    # ---- conv2: merged-tap matmul, batch folded ----
    ls2[:, C1:2 * C1] = p1
    for b in range(B):
        r = b * P1
        ls2[r + 1:r + P1, 0:C1] = p1[r:r + P1 - 1, :]
        ls2[r:r + P1 - 1, 2 * C1:3 * C1] = p1[r + 1:r + P1, :]
    h2s[...] = jnp.maximum(
        jnp.dot(ls2[...].astype(BF16), _ld(p_ref, "w2m"),
                preferred_element_type=F32) + _ld(p_ref, "b2"), 0.0)      # (16,32)

    # ---- pool2 ----
    p2 = jnp.maximum(h2s[pl.ds(0, B * P2, stride=2), :],
                     h2s[pl.ds(1, B * P2, stride=2), :])                  # (8,32)

    # ---- conv3: merged-tap matmul, batch folded ----
    ls3[:, C2:2 * C2] = p2
    for b in range(B):
        r = b * P2
        ls3[r + 1:r + P2, 0:C2] = p2[r:r + P2 - 1, :]
        ls3[r:r + P2 - 1, 2 * C2:3 * C2] = p2[r + 1:r + P2, :]
    h3 = jnp.maximum(
        jnp.dot(ls3[...].astype(BF16), _ld(p_ref, "w3m"),
                preferred_element_type=F32) + _ld(p_ref, "b3"), 0.0)      # (8,32)

    # ---- attention: Linear -> ReLU -> Linear -> per-batch softmax pooling ----
    ah = jnp.maximum(
        jnp.dot(h3.astype(BF16), _ld(p_ref, "wa1"),
                preferred_element_type=F32) + _ld(p_ref, "ba1"), 0.0)     # (8,16)
    logits = (jnp.dot(ah.astype(BF16), _ld(p_ref, "wa2"),
                      preferred_element_type=F32) + _ld(p_ref, "ba2"))    # (8, 1)
    # shifting by the GLOBAL max is per-batch equivalent (cancels in the ratio)
    m = jnp.max(logits, axis=0, keepdims=True)                            # (1, 1)
    e = jnp.exp(logits - m)                                               # (8, 1)
    # one segment-indicator matmul yields per-batch numerator AND denominator
    num_den = jnp.dot(_ld(p_ref, "seg"),
                      jnp.concatenate([e * h3, e], axis=-1).astype(BF16),
                      preferred_element_type=F32)                         # (B, C3+1)
    ctx = num_den[:, 0:C3] * pl.reciprocal(num_den[:, C3:C3 + 1], approx=True)
    # dropout -> identity (eval mode)

    # ---- fc1: single consolidated store for the whole batch ----
    out_ref[...] = (jnp.dot(ctx.astype(BF16), _ld(p_ref, "wfc"),
                            preferred_element_type=F32) + _ld(p_ref, "bfc"))


# ----------------------------- wrapper ---------------------------------------
@jax.jit
def cnn3l_forward(tokens, surf, slab):
    tok2 = tokens.reshape(B * L, 1)         # trivial row-major reshapes (fused by jit)
    surf2 = surf.reshape(B * L, 1)
    return pl.pallas_call(
        cnn3l_kernel,
        out_shape=jax.ShapeDtypeStruct((B, NUM_CLASSES), F32),
        grid=(1,),
        in_specs=[
            pl.BlockSpec((B * L, 1), lambda i: (0, 0)),            # tokens
            pl.BlockSpec((B * L, 1), lambda i: (0, 0)),            # surface availability
            pl.BlockSpec((SLAB_ROWS, SLAB_LANES), lambda i: (0, 0)),  # bf16 param slab
        ],
        out_specs=pl.BlockSpec((B, NUM_CLASSES), lambda i: (0, 0)),
        scratch_shapes=[
            pltpu.VMEM((B * L, K * CIN), F32),   # conv1 im2col LHS (zero halo)
            pltpu.VMEM((B * L, C1), F32),        # conv1 output (pool1 strided reads)
            pltpu.VMEM((B * P1, K * C1), F32),   # conv2 merged LHS (zero halo)
            pltpu.VMEM((B * P1, C2), F32),       # conv2 output (pool2 strided reads)
            pltpu.VMEM((B * P2, K * C2), F32),   # conv3 merged LHS (zero halo)
        ],
        compiler_params=pltpu.CompilerParams(
            dimension_semantics=("arbitrary",)),
    )(tok2, surf2, slab)


# ------------------------- pure-JAX reference --------------------------------
def ref_forward(tokens, surf, p):
    emb = p["emb"][tokens]
    x = jnp.concatenate([emb, surf[..., None]], axis=-1)           # (B, L, CIN)

    def conv_relu(x, w, b, l_out):
        xp = jnp.pad(x, ((0, 0), (PAD, PAD), (0, 0)))
        acc = sum(jnp.einsum("blc,co->blo", xp[:, t:t + l_out, :], w[t])
                  for t in range(K))
        return jax.nn.relu(acc + b[None])

    def pool(h):
        bb, ll, cc = h.shape
        return jnp.max(h.reshape(bb, ll // 2, 2, cc), axis=2)

    h1 = conv_relu(x, p["w1"], p["b1"], L)
    p1 = pool(h1)
    h2 = conv_relu(p1, p["w2"], p["b2"], P1)
    p2 = pool(h2)
    h3 = conv_relu(p2, p["w3"], p["b3"], P2)                       # (B, P2, C3)
    ah = jax.nn.relu(h3 @ p["wa1"] + p["ba1"])
    logits = ah @ p["wa2"] + p["ba2"]                              # (B, P2, 1)
    attn = jax.nn.softmax(logits, axis=1)
    ctx = jnp.sum(attn * h3, axis=1)                               # (B, C3)
    return ctx @ p["wfc"] + p["bfc"]


# ----------------------------- params / main ---------------------------------
def init_params(key):
    ks = jax.random.split(key, 13)
    n = lambda k, shape, s=0.1: (jax.random.normal(k, shape, F32) * s)
    return {
        "emb": jax.random.normal(ks[0], (NUM_CATEGORIES, EMB), F32),
        "w1": n(ks[1], (K, CIN, C1)), "b1": n(ks[2], (1, C1)),
        "w2": n(ks[3], (K, C1, C2)), "b2": n(ks[4], (1, C2)),
        "w3": n(ks[5], (K, C2, C3)), "b3": n(ks[6], (1, C3)),
        "wa1": n(ks[7], (C3, C3 // 2)), "ba1": n(ks[8], (1, C3 // 2)),
        "wa2": n(ks[9], (C3 // 2, 1)), "ba2": n(ks[10], (1, 1)),
        "wfc": n(ks[11], (C3, NUM_CLASSES)), "bfc": n(ks[12], (1, NUM_CLASSES)),
    }


if __name__ == "__main__":
    key = jax.random.PRNGKey(0)
    kp, kt, ks = jax.random.split(key, 3)
    params = init_params(kp)
    tokens = jax.random.randint(kt, (B, L), 0, NUM_CATEGORIES, dtype=jnp.int32)
    surf = jax.random.uniform(ks, (B, L), dtype=F32)

    slab = pack_params(params)          # one-time, host-side (outside per-call path)

    out = cnn3l_forward(tokens, surf, slab)
    out = jax.block_until_ready(out)

    ref = jax.block_until_ready(ref_forward(tokens, surf, params))
    if not np.allclose(np.asarray(out), np.asarray(ref), rtol=2e-2, atol=2e-2):
        raise AssertionError(f"mismatch:\n{out}\nvs\n{ref}")

    print("KERNEL_OK")
</pallas_src>

<mosaic_0001>
module attributes {stable_mosaic.version = 11 : i64} {
  func.func @cnn3l_kernel(%arg0: i32, %arg1: memref<32x1xi32, #tpu.memory_space<vmem>>, %arg2: memref<32x1xf32, #tpu.memory_space<vmem>>, %arg3: memref<384x128xbf16, #tpu.memory_space<vmem>>, %arg4: memref<2x4xf32, #tpu.memory_space<vmem>>, %arg5: memref<32x27xf32, #tpu.memory_space<vmem>>, %arg6: memref<32x16xf32, #tpu.memory_space<vmem>>, %arg7: memref<16x48xf32, #tpu.memory_space<vmem>>, %arg8: memref<16x32xf32, #tpu.memory_space<vmem>>, %arg9: memref<8x96xf32, #tpu.memory_space<vmem>>) attributes {dimension_semantics = [#tpu.dimension_semantics<arbitrary>], iteration_bounds = array<i64: 1>, scalar_prefetch = 0 : i64, scratch_operands = 5 : i64, tpu.core_type = #tpu.core_type<tc>, window_params = [{pipeline_mode = #tpu.pipeline_mode<synchronous>, transform_indices = @transform_0, window_bounds = array<i64: 32, 1>}, {pipeline_mode = #tpu.pipeline_mode<synchronous>, transform_indices = @transform_1, window_bounds = array<i64: 32, 1>}, {pipeline_mode = #tpu.pipeline_mode<synchronous>, transform_indices = @transform_2, window_bounds = array<i64: 384, 128>}, {pipeline_mode = #tpu.pipeline_mode<synchronous>, transform_indices = @transform_3, window_bounds = array<i64: 2, 4>}]} {
    %cst = arith.constant 0.000000e+00 : f32
    %0 = vector.broadcast %cst : f32 to vector<32x27xf32>
    %c0 = arith.constant 0 : index
    %c0_0 = arith.constant 0 : index
    %1 = vector.load %arg5[%c0, %c0_0] : memref<32x27xf32, #tpu.memory_space<vmem>>, vector<32x27xf32>
    tpu.vector_store %arg5[%c0, %c0_0], %0 {strides = array<i32>} : memref<32x27xf32, #tpu.memory_space<vmem>>, vector<32x27xf32>,
    %cst_1 = arith.constant 0.000000e+00 : f32
    %2 = vector.broadcast %cst_1 : f32 to vector<16x48xf32>
    %c0_2 = arith.constant 0 : index
    %c0_3 = arith.constant 0 : index
    %3 = vector.load %arg7[%c0_2, %c0_3] : memref<16x48xf32, #tpu.memory_space<vmem>>, vector<16x48xf32>
    tpu.vector_store %arg7[%c0_2, %c0_3], %2 {strides = array<i32>} : memref<16x48xf32, #tpu.memory_space<vmem>>, vector<16x48xf32>,
    %cst_4 = arith.constant 0.000000e+00 : f32
    %4 = vector.broadcast %cst_4 : f32 to vector<8x96xf32>
    %c0_5 = arith.constant 0 : index
    %c0_6 = arith.constant 0 : index
    %5 = vector.load %arg9[%c0_5, %c0_6] : memref<8x96xf32, #tpu.memory_space<vmem>>, vector<8x96xf32>
    tpu.vector_store %arg9[%c0_5, %c0_6], %4 {strides = array<i32>} : memref<8x96xf32, #tpu.memory_space<vmem>>, vector<8x96xf32>,
    %6 = tpu.iota {dimensions = array<i32: 1>} : vector<32x16xi32>
    %c0_7 = arith.constant 0 : index
    %c0_8 = arith.constant 0 : index
    %7 = vector.load %arg1[%c0_7, %c0_8] : memref<32x1xi32, #tpu.memory_space<vmem>>, vector<32x1xi32>
    %8 = vector.broadcast %7 : vector<32x1xi32> to vector<32x16xi32>
    %9 = arith.cmpi eq, %8, %6 : vector<32x16xi32>
    %cst_9 = arith.constant 1.000000e+00 : f32
    %cst_10 = arith.constant 0.000000e+00 : f32
    %10 = vector.broadcast %cst_9 : f32 to vector<32x16xf32>
    %11 = vector.broadcast %cst_10 : f32 to vector<32x16xf32>
    %12 = arith.select %9, %10, %11 : vector<32x16xi1>, vector<32x16xf32>
    %13 = arith.truncf %12 : vector<32x16xf32> to vector<32x16xbf16>
    %c0_11 = arith.constant 0 : index
    %c0_12 = arith.constant 0 : index
    %14 = vector.load %arg3[%c0_11, %c0_12] : memref<384x128xbf16, #tpu.memory_space<vmem>>, vector<16x8xbf16>
    %cst_13 = arith.constant dense<0.000000e+00> : vector<32x8xf32>
    %15 = tpu.matmul %13, %14, %cst_13 {dimension_numbers = #tpu.dot_dimension_numbers<[1], [0], [0], [1], [0, 0, 1, 1], [], []>} : vector<32x16xbf16>, vector<16x8xbf16>, vector<32x8xf32> -> vector<32x8xf32>
    %c0_14 = arith.constant 0 : index
    %c0_15 = arith.constant 0 : index
    %16 = vector.load %arg2[%c0_14, %c0_15] : memref<32x1xf32, #tpu.memory_space<vmem>>, vector<32x1xf32>
    %17 = tpu.concatenate %15, %16 in 1 : vector<32x8xf32>, vector<32x1xf32> -> vector<32x9xf32>
    %c0_16 = arith.constant 0 : index
    %c9 = arith.constant 9 : index
    %18 = vector.load %arg5[%c0_16, %c9] : memref<32x27xf32, #tpu.memory_space<vmem>>, vector<32x9xf32>
    tpu.vector_store %arg5[%c0_16, %c9], %17 {strides = array<i32>} : memref<32x27xf32, #tpu.memory_space<vmem>>, vector<32x9xf32>,
    %19 = vector.extract_strided_slice %17 {offsets = [0, 0], sizes = [15, 9], strides = [1, 1]} : vector<32x9xf32> to vector<15x9xf32>
    %c1 = arith.constant 1 : index
    %c0_17 = arith.constant 0 : index
    %20 = vector.load %arg5[%c1, %c0_17] : memref<32x27xf32, #tpu.memory_space<vmem>>, vector<15x9xf32>
    tpu.vector_store %arg5[%c1, %c0_17], %19 {strides = array<i32>} : memref<32x27xf32, #tpu.memory_space<vmem>>, vector<15x9xf32>,
    %21 = vector.extract_strided_slice %17 {offsets = [1, 0], sizes = [15, 9], strides = [1, 1]} : vector<32x9xf32> to vector<15x9xf32>
    %c0_18 = arith.constant 0 : index
    %c18 = arith.constant 18 : index
    %22 = vector.load %arg5[%c0_18, %c18] : memref<32x27xf32, #tpu.memory_space<vmem>>, vector<15x9xf32>
    tpu.vector_store %arg5[%c0_18, %c18], %21 {strides = array<i32>} : memref<32x27xf32, #tpu.memory_space<vmem>>, vector<15x9xf32>,
    %23 = vector.extract_strided_slice %17 {offsets = [16, 0], sizes = [15, 9], strides = [1, 1]} : vector<32x9xf32> to vector<15x9xf32>
    %c17 = arith.constant 17 : index
    %c0_19 = arith.constant 0 : index
    %24 = vector.load %arg5[%c17, %c0_19] : memref<32x27xf32, #tpu.memory_space<vmem>>, vector<15x9xf32>
    tpu.vector_store %arg5[%c17, %c0_19], %23 {strides = array<i32>} : memref<32x27xf32, #tpu.memory_space<vmem>>, vector<15x9xf32>,
    %25 = vector.extract_strided_slice %17 {offsets = [17, 0], sizes = [15, 9], strides = [1, 1]} : vector<32x9xf32> to vector<15x9xf32>
    %c16 = arith.constant 16 : index
    %c18_20 = arith.constant 18 : index
    %26 = vector.load %arg5[%c16, %c18_20] : memref<32x27xf32, #tpu.memory_space<vmem>>, vector<15x9xf32>
    tpu.vector_store %arg5[%c16, %c18_20], %25 {strides = array<i32>} : memref<32x27xf32, #tpu.memory_space<vmem>>, vector<15x9xf32>,
    %c0_21 = arith.constant 0 : index
    %c0_22 = arith.constant 0 : index
    %27 = vector.load %arg5[%c0_21, %c0_22] : memref<32x27xf32, #tpu.memory_space<vmem>>, vector<32x27xf32>
    %28 = arith.truncf %27 : vector<32x27xf32> to vector<32x27xbf16>
    %c16_23 = arith.constant 16 : index
    %c0_24 = arith.constant 0 : index
    %29 = vector.load %arg3[%c16_23, %c0_24] : memref<384x128xbf16, #tpu.memory_space<vmem>>, vector<27x16xbf16>
    %cst_25 = arith.constant dense<0.000000e+00> : vector<32x16xf32>
    %30 = tpu.matmul %28, %29, %cst_25 {dimension_numbers = #tpu.dot_dimension_numbers<[1], [0], [0], [1], [0, 0, 1, 1], [], []>} : vector<32x27xbf16>, vector<27x16xbf16>, vector<32x16xf32> -> vector<32x16xf32>
    %c48 = arith.constant 48 : index
    %c0_26 = arith.constant 0 : index
    %31 = vector.load %arg3[%c48, %c0_26] : memref<384x128xbf16, #tpu.memory_space<vmem>>, vector<1x16xbf16>
    %32 = arith.extf %31 : vector<1x16xbf16> to vector<1x16xf32>
    %33 = vector.broadcast %32 : vector<1x16xf32> to vector<32x16xf32>
    %34 = arith.addf %30, %33 : vector<32x16xf32>
    %cst_27 = arith.constant 0.000000e+00 : f32
    %35 = vector.broadcast %cst_27 : f32 to vector<32x16xf32>
    %36 = arith.maximumf %34, %35 : vector<32x16xf32>
    %c0_28 = arith.constant 0 : index
    %c0_29 = arith.constant 0 : index
    %37 = vector.load %arg6[%c0_28, %c0_29] : memref<32x16xf32, #tpu.memory_space<vmem>>, vector<32x16xf32>
    tpu.vector_store %arg6[%c0_28, %c0_29], %36 {strides = array<i32>} : memref<32x16xf32, #tpu.memory_space<vmem>>, vector<32x16xf32>,
    %c0_30 = arith.constant 0 : index
    %c0_31 = arith.constant 0 : index
    %38 = tpu.strided_load %arg6[%c0_30, %c0_31] {strides = array<i32: 2, 1>} : memref<32x16xf32, #tpu.memory_space<vmem>>, vector<16x16xf32>
    %c1_32 = arith.constant 1 : index
    %c0_33 = arith.constant 0 : index
    %39 = tpu.strided_load %arg6[%c1_32, %c0_33] {strides = array<i32: 2, 1>} : memref<32x16xf32, #tpu.memory_space<vmem>>, vector<16x16xf32>
    %40 = arith.maximumf %38, %39 : vector<16x16xf32>
    %c0_34 = arith.constant 0 : index
    %c16_35 = arith.constant 16 : index
    %41 = vector.load %arg7[%c0_34, %c16_35] : memref<16x48xf32, #tpu.memory_space<vmem>>, vector<16x16xf32>
    tpu.vector_store %arg7[%c0_34, %c16_35], %40 {strides = array<i32>} : memref<16x48xf32, #tpu.memory_space<vmem>>, vector<16x16xf32>,
    %42 = vector.extract_strided_slice %40 {offsets = [0, 0], sizes = [7, 16], strides = [1, 1]} : vector<16x16xf32> to vector<7x16xf32>
    %c1_36 = arith.constant 1 : index
    %c0_37 = arith.constant 0 : index
    %43 = vector.load %arg7[%c1_36, %c0_37] : memref<16x48xf32, #tpu.memory_space<vmem>>, vector<7x16xf32>
    tpu.vector_store %arg7[%c1_36, %c0_37], %42 {strides = array<i32>} : memref<16x48xf32, #tpu.memory_space<vmem>>, vector<7x16xf32>,
    %44 = vector.extract_strided_slice %40 {offsets = [1, 0], sizes = [7, 16], strides = [1, 1]} : vector<16x16xf32> to vector<7x16xf32>
    %c0_38 = arith.constant 0 : index
    %c32 = arith.constant 32 : index
    %45 = vector.load %arg7[%c0_38, %c32] : memref<16x48xf32, #tpu.memory_space<vmem>>, vector<7x16xf32>
    tpu.vector_store %arg7[%c0_38, %c32], %44 {strides = array<i32>} : memref<16x48xf32, #tpu.memory_space<vmem>>, vector<7x16xf32>,
    %46 = vector.extract_strided_slice %40 {offsets = [8, 0], sizes = [7, 16], strides = [1, 1]} : vector<16x16xf32> to vector<7x16xf32>
    %c9_39 = arith.constant 9 : index
    %c0_40 = arith.constant 0 : index
    %47 = vector.load %arg7[%c9_39, %c0_40] : memref<16x48xf32, #tpu.memory_space<vmem>>, vector<7x16xf32>
    tpu.vector_store %arg7[%c9_39, %c0_40], %46 {strides = array<i32>} : memref<16x48xf32, #tpu.memory_space<vmem>>, vector<7x16xf32>,
    %48 = vector.extract_strided_slice %40 {offsets = [9, 0], sizes = [7, 16], strides = [1, 1]} : vector<16x16xf32> to vector<7x16xf32>
    %c8 = arith.constant 8 : index
    %c32_41 = arith.constant 32 : index
    %49 = vector.load %arg7[%c8, %c32_41] : memref<16x48xf32, #tpu.memory_space<vmem>>, vector<7x16xf32>
    tpu.vector_store %arg7[%c8, %c32_41], %48 {strides = array<i32>} : memref<16x48xf32, #tpu.memory_space<vmem>>, vector<7x16xf32>,
    %c0_42 = arith.constant 0 : index
    %c0_43 = arith.constant 0 : index
    %50 = vector.load %arg7[%c0_42, %c0_43] : memref<16x48xf32, #tpu.memory_space<vmem>>, vector<16x48xf32>
    %51 = arith.truncf %50 : vector<16x48xf32> to vector<16x48xbf16>
    %c64 = arith.constant 64 : index
    %c0_44 = arith.constant 0 : index
    %52 = vector.load %arg3[%c64, %c0_44] : memref<384x128xbf16, #tpu.memory_space<vmem>>, vector<48x32xbf16>
    %cst_45 = arith.constant dense<0.000000e+00> : vector<16x32xf32>
    %53 = tpu.matmul %51, %52, %cst_45 {dimension_numbers = #tpu.dot_dimension_numbers<[1], [0], [0], [1], [0, 0, 1, 1], [], []>} : vector<16x48xbf16>, vector<48x32xbf16>, vector<16x32xf32> -> vector<16x32xf32>
    %c112 = arith.constant 112 : index
    %c0_46 = arith.constant 0 : index
    %54 = vector.load %arg3[%c112, %c0_46] : memref<384x128xbf16, #tpu.memory_space<vmem>>, vector<1x32xbf16>
    %55 = arith.extf %54 : vector<1x32xbf16> to vector<1x32xf32>
    %56 = vector.broadcast %55 : vector<1x32xf32> to vector<16x32xf32>
    %57 = arith.addf %53, %56 : vector<16x32xf32>
    %cst_47 = arith.constant 0.000000e+00 : f32
    %58 = vector.broadcast %cst_47 : f32 to vector<16x32xf32>
    %59 = arith.maximumf %57, %58 : vector<16x32xf32>
    %c0_48 = arith.constant 0 : index
    %c0_49 = arith.constant 0 : index
    %60 = vector.load %arg8[%c0_48, %c0_49] : memref<16x32xf32, #tpu.memory_space<vmem>>, vector<16x32xf32>
    tpu.vector_store %arg8[%c0_48, %c0_49], %59 {strides = array<i32>} : memref<16x32xf32, #tpu.memory_space<vmem>>, vector<16x32xf32>,
    %c0_50 = arith.constant 0 : index
    %c0_51 = arith.constant 0 : index
    %61 = tpu.strided_load %arg8[%c0_50, %c0_51] {strides = array<i32: 2, 1>} : memref<16x32xf32, #tpu.memory_space<vmem>>, vector<8x32xf32>
    %c1_52 = arith.constant 1 : index
    %c0_53 = arith.constant 0 : index
    %62 = tpu.strided_load %arg8[%c1_52, %c0_53] {strides = array<i32: 2, 1>} : memref<16x32xf32, #tpu.memory_space<vmem>>, vector<8x32xf32>
    %63 = arith.maximumf %61, %62 : vector<8x32xf32>
    %c0_54 = arith.constant 0 : index
    %c32_55 = arith.constant 32 : index
    %64 = vector.load %arg9[%c0_54, %c32_55] : memref<8x96xf32, #tpu.memory_space<vmem>>, vector<8x32xf32>
    tpu.vector_store %arg9[%c0_54, %c32_55], %63 {strides = array<i32>} : memref<8x96xf32, #tpu.memory_space<vmem>>, vector<8x32xf32>,
    %65 = vector.extract_strided_slice %63 {offsets = [0, 0], sizes = [3, 32], strides = [1, 1]} : vector<8x32xf32> to vector<3x32xf32>
    %c1_56 = arith.constant 1 : index
    %c0_57 = arith.constant 0 : index
    %66 = vector.load %arg9[%c1_56, %c0_57] : memref<8x96xf32, #tpu.memory_space<vmem>>, vector<3x32xf32>
    tpu.vector_store %arg9[%c1_56, %c0_57], %65 {strides = array<i32>} : memref<8x96xf32, #tpu.memory_space<vmem>>, vector<3x32xf32>,
    %67 = vector.extract_strided_slice %63 {offsets = [1, 0], sizes = [3, 32], strides = [1, 1]} : vector<8x32xf32> to vector<3x32xf32>
    %c0_58 = arith.constant 0 : index
    %c64_59 = arith.constant 64 : index
    %68 = vector.load %arg9[%c0_58, %c64_59] : memref<8x96xf32, #tpu.memory_space<vmem>>, vector<3x32xf32>
    tpu.vector_store %arg9[%c0_58, %c64_59], %67 {strides = array<i32>} : memref<8x96xf32, #tpu.memory_space<vmem>>, vector<3x32xf32>,
    %69 = vector.extract_strided_slice %63 {offsets = [4, 0], sizes = [3, 32], strides = [1, 1]} : vector<8x32xf32> to vector<3x32xf32>
    %c5 = arith.constant 5 : index
    %c0_60 = arith.constant 0 : index
    %70 = vector.load %arg9[%c5, %c0_60] : memref<8x96xf32, #tpu.memory_space<vmem>>, vector<3x32xf32>
    tpu.vector_store %arg9[%c5, %c0_60], %69 {strides = array<i32>} : memref<8x96xf32, #tpu.memory_space<vmem>>, vector<3x32xf32>,
    %71 = vector.extract_strided_slice %63 {offsets = [5, 0], sizes = [3, 32], strides = [1, 1]} : vector<8x32xf32> to vector<3x32xf32>
    %c4 = arith.constant 4 : index
    %c64_61 = arith.constant 64 : index
    %72 = vector.load %arg9[%c4, %c64_61] : memref<8x96xf32, #tpu.memory_space<vmem>>, vector<3x32xf32>
    tpu.vector_store %arg9[%c4, %c64_61], %71 {strides = array<i32>} : memref<8x96xf32, #tpu.memory_space<vmem>>, vector<3x32xf32>,
    %c0_62 = arith.constant 0 : index
    %c0_63 = arith.constant 0 : index
    %73 = vector.load %arg9[%c0_62, %c0_63] : memref<8x96xf32, #tpu.memory_space<vmem>>, vector<8x96xf32>
    %74 = arith.truncf %73 : vector<8x96xf32> to vector<8x96xbf16>
    %c128 = arith.constant 128 : index
    %c0_64 = arith.constant 0 : index
    %75 = vector.load %arg3[%c128, %c0_64] : memref<384x128xbf16, #tpu.memory_space<vmem>>, vector<96x32xbf16>
    %cst_65 = arith.constant dense<0.000000e+00> : vector<8x32xf32>
    %76 = tpu.matmul %74, %75, %cst_65 {dimension_numbers = #tpu.dot_dimension_numbers<[1], [0], [0], [1], [0, 0, 1, 1], [], []>} : vector<8x96xbf16>, vector<96x32xbf16>, vector<8x32xf32> -> vector<8x32xf32>
    %c224 = arith.constant 224 : index
    %c0_66 = arith.constant 0 : index
    %77 = vector.load %arg3[%c224, %c0_66] : memref<384x128xbf16, #tpu.memory_space<vmem>>, vector<1x32xbf16>
    %78 = arith.extf %77 : vector<1x32xbf16> to vector<1x32xf32>
    %79 = vector.broadcast %78 : vector<1x32xf32> to vector<8x32xf32>
    %80 = arith.addf %76, %79 : vector<8x32xf32>
    %cst_67 = arith.constant 0.000000e+00 : f32
    %81 = vector.broadcast %cst_67 : f32 to vector<8x32xf32>
    %82 = arith.maximumf %80, %81 : vector<8x32xf32>
    %83 = arith.truncf %82 : vector<8x32xf32> to vector<8x32xbf16>
    %c240 = arith.constant 240 : index
    %c0_68 = arith.constant 0 : index
    %84 = vector.load %arg3[%c240, %c0_68] : memref<384x128xbf16, #tpu.memory_space<vmem>>, vector<32x16xbf16>
    %cst_69 = arith.constant dense<0.000000e+00> : vector<8x16xf32>
    %85 = tpu.matmul %83, %84, %cst_69 {dimension_numbers = #tpu.dot_dimension_numbers<[1], [0], [0], [1], [0, 0, 1, 1], [], []>} : vector<8x32xbf16>, vector<32x16xbf16>, vector<8x16xf32> -> vector<8x16xf32>
    %c272 = arith.constant 272 : index
    %c0_70 = arith.constant 0 : index
    %86 = vector.load %arg3[%c272, %c0_70] : memref<384x128xbf16, #tpu.memory_space<vmem>>, vector<1x16xbf16>
    %87 = arith.extf %86 : vector<1x16xbf16> to vector<1x16xf32>
    %88 = vector.broadcast %87 : vector<1x16xf32> to vector<8x16xf32>
    %89 = arith.addf %85, %88 : vector<8x16xf32>
    %cst_71 = arith.constant 0.000000e+00 : f32
    %90 = vector.broadcast %cst_71 : f32 to vector<8x16xf32>
    %91 = arith.maximumf %89, %90 : vector<8x16xf32>
    %92 = arith.truncf %91 : vector<8x16xf32> to vector<8x16xbf16>
    %c288 = arith.constant 288 : index
    %c0_72 = arith.constant 0 : index
    %93 = vector.load %arg3[%c288, %c0_72] : memref<384x128xbf16, #tpu.memory_space<vmem>>, vector<16x1xbf16>
    %cst_73 = arith.constant dense<0.000000e+00> : vector<8x1xf32>
    %94 = tpu.matmul %92, %93, %cst_73 {dimension_numbers = #tpu.dot_dimension_numbers<[1], [0], [0], [1], [0, 0, 1, 1], [], []>} : vector<8x16xbf16>, vector<16x1xbf16>, vector<8x1xf32> -> vector<8x1xf32>
    %c304 = arith.constant 304 : index
    %c0_74 = arith.constant 0 : index
    %95 = vector.load %arg3[%c304, %c0_74] : memref<384x128xbf16, #tpu.memory_space<vmem>>, vector<1x1xbf16>
    %96 = arith.extf %95 : vector<1x1xbf16> to vector<1x1xf32>
    %97 = vector.broadcast %96 : vector<1x1xf32> to vector<8x1xf32>
    %98 = arith.addf %94, %97 : vector<8x1xf32>
    %cst_75 = arith.constant dense<0xFF800000> : vector<1xf32>
    %99 = vector.multi_reduction <maximumf>, %98, %cst_75 [0] : vector<8x1xf32> to vector<1xf32>
    %100 = vector.shape_cast %99 : vector<1xf32> to vector<1x1xf32>
    %101 = vector.broadcast %100 : vector<1x1xf32> to vector<8x1xf32>
    %102 = arith.subf %98, %101 : vector<8x1xf32>
    %103 = math.exp %102 : vector<8x1xf32>
    %c368 = arith.constant 368 : index
    %c0_76 = arith.constant 0 : index
    %104 = vector.load %arg3[%c368, %c0_76] : memref<384x128xbf16, #tpu.memory_space<vmem>>, vector<2x8xbf16>
    %105 = vector.broadcast %103 : vector<8x1xf32> to vector<8x32xf32>
    %106 = arith.mulf %105, %82 : vector<8x32xf32>
    %107 = tpu.concatenate %106, %103 in 1 : vector<8x32xf32>, vector<8x1xf32> -> vector<8x33xf32>
    %108 = arith.truncf %107 : vector<8x33xf32> to vector<8x33xbf16>
    %cst_77 = arith.constant dense<0.000000e+00> : vector<2x33xf32>
    %109 = tpu.matmul %104, %108, %cst_77 {dimension_numbers = #tpu.dot_dimension_numbers<[1], [0], [0], [1], [0, 0, 1, 1], [], []>} : vector<2x8xbf16>, vector<8x33xbf16>, vector<2x33xf32> -> vector<2x33xf32>
    %110 = vector.extract_strided_slice %109 {offsets = [0, 0], sizes = [2, 32], strides = [1, 1]} : vector<2x33xf32> to vector<2x32xf32>
    %111 = vector.extract_strided_slice %109 {offsets = [0, 32], sizes = [2, 1], strides = [1, 1]} : vector<2x33xf32> to vector<2x1xf32>
    %112 = tpu.reciprocal %111 {approx = true} : vector<2x1xf32> -> vector<2x1xf32>
    %113 = vector.broadcast %112 : vector<2x1xf32> to vector<2x32xf32>
    %114 = arith.mulf %110, %113 : vector<2x32xf32>
    %115 = arith.truncf %114 : vector<2x32xf32> to vector<2x32xbf16>
    %c320 = arith.constant 320 : index
    %c0_78 = arith.constant 0 : index
    %116 = vector.load %arg3[%c320, %c0_78] : memref<384x128xbf16, #tpu.memory_space<vmem>>, vector<32x4xbf16>
    %cst_79 = arith.constant dense<0.000000e+00> : vector<2x4xf32>
    %117 = tpu.matmul %115, %116, %cst_79 {dimension_numbers = #tpu.dot_dimension_numbers<[1], [0], [0], [1], [0, 0, 1, 1], [], []>} : vector<2x32xbf16>, vector<32x4xbf16>, vector<2x4xf32> -> vector<2x4xf32>
    %c352 = arith.constant 352 : index
    %c0_80 = arith.constant 0 : index
    %118 = vector.load %arg3[%c352, %c0_80] : memref<384x128xbf16, #tpu.memory_space<vmem>>, vector<1x4xbf16>
    %119 = arith.extf %118 : vector<1x4xbf16> to vector<1x4xf32>
    %120 = vector.broadcast %119 : vector<1x4xf32> to vector<2x4xf32>
    %121 = arith.addf %117, %120 : vector<2x4xf32>
    %c0_81 = arith.constant 0 : index
    %c0_82 = arith.constant 0 : index
    %122 = vector.load %arg4[%c0_81, %c0_82] : memref<2x4xf32, #tpu.memory_space<vmem>>, vector<2x4xf32>
    tpu.vector_store %arg4[%c0_81, %c0_82], %121 {strides = array<i32>} : memref<2x4xf32, #tpu.memory_space<vmem>>, vector<2x4xf32>,
    return
  }
  func.func @transform_0(%arg0: i32) -> (i32, i32) {
    %c0_i32 = arith.constant 0 : i32
    %c0_i32_0 = arith.constant 0 : i32
    %c0_i32_1 = arith.constant 0 : i32
    return %c0_i32, %c0_i32_0 : i32, i32
  }
  func.func @transform_1(%arg0: i32) -> (i32, i32) {
    %c0_i32 = arith.constant 0 : i32
    %c0_i32_0 = arith.constant 0 : i32
    %c0_i32_1 = arith.constant 0 : i32
    return %c0_i32, %c0_i32_0 : i32, i32
  }
  func.func @transform_2(%arg0: i32) -> (i32, i32) {
    %c0_i32 = arith.constant 0 : i32
    %c0_i32_0 = arith.constant 0 : i32
    %c0_i32_1 = arith.constant 0 : i32
    return %c0_i32, %c0_i32_0 : i32, i32
  }
  func.func @transform_3(%arg0: i32) -> (i32, i32) {
    %c0_i32 = arith.constant 0 : i32
    %c0_i32_0 = arith.constant 0 : i32
    %c0_i32_1 = arith.constant 0 : i32
    return %c0_i32, %c0_i32_0 : i32, i32
  }
}

</mosaic_0001>

<bundles_post_ra>
// kernel: cnn3l_forward.1
= control target key start
LH: loop header
LB: loop body
LE: loop exit
PB: predicated region body
PF: predicated region fallthrough
CT: control target
= control target key end

     0   :  { %8 = vsyncpa [#allocation8], 0  ;;  %s1193_s0 = inlined_call_operand.vmem [shape: s32[32,1], index: 0, kind: input, shape index: {}]   ;;  %s1194_s1 = inlined_call_operand.vmem [shape: f32[32,1], index: 1, kind: input, shape index: {}]   ;;  %s1195_s2 = inlined_call_operand.hbm [shape: bf16[384,128], index: 2, kind: input, shape index: {}]   ;;  %s1196_s3 = inlined_call_operand.hbm [shape: f32[2,4], index: 3, kind: output, shape index: {}]  }
   0x1   :  { %9 = vsyncpa [#allocation9], 0  ;;  %s1028_s12 = smov [#allocation7]   ;;  %s980_s16 = scalar_lea.hbm %s1195_s2, 3072 }
   0x2   :  { %s19_s13 = sshll.u32 %s1028_s12, 4  ;;  %p981_p0 = scmp.ne.s32.totalorder %s1195_s2, %s980_s16  ;;  %s20_s13 = int_to_ptr.vmem [resolvable:$true] %s19_s13 }
   0x3   :  { %p984_p1 = scmp.lt.u32.totalorder %s980_s16, %s1195_s2 }
   0x5   :  { %p986_p2 = pnand %p984_p1, %p981_p0 }
   0x7   :  { %989 = shalt.err (!%p986_p2)
}
   0x8   :  { %s990_s21 = scalar_lea.vmem %s20_s13, 3072  ;;  %p995_p4 = scmp.lt.s32.totalorder %s20_s13, %s20_s13 }
   0x9   :  { %p991_p3 = scmp.ne.s32.totalorder %s20_s13, %s990_s21  ;;  %p996_p5 = scmp.lt.s32.totalorder %s990_s21, %s990_s21 }
   0xb   :  { %p997_p6 = por %p996_p5, %p995_p4 }
   0xd   :  { %p998_p7 = pnand %p997_p6, %p991_p3 }
   0xf   :  { %1001 = shalt.err (!%p998_p7)
}
  0x10   :  { %s1029_s22 = smov 64   ;;  %s1030_s23 = smov 4  }
  0x11   :  { %25 = dma.hbm_to_vmem [thread:$0]  %s1195_s2, 3072, %s20_s13, [#allocation8], %s1029_s22, %s1029_s22, %s1030_s23  }
  0x12   :  { %1024 = dma.done.wait [#allocation8], 3072  }
  0x13   :  { %1025 = vsyncadd [#allocation8], 4294964224  ;;  %v1031_v0 = vmov 0   ;;  %v44_v1 = vld [vmem:[%s1193_s0 + $0x10] sm:$0xff]  ;;  %v42_v2 = vld [vmem:[%s1193_s0] sm:$0xff]  ;;  %v1032_v6 = vmov 0.0   ;;  %v40_v11 = vlaneseq }
  0x14   :  { %957 = vset.pattern.permute.xlu1 %v1031_v0  ;;  %956 = vset.pattern.permute.xlu0 %v1031_v0  ;;  %v45_v3 = vld [vmem:[%s1193_s0 + $0x18] sm:$0xff]  ;;  %v43_v4 = vld [vmem:[%s1193_s0 + $0x8] sm:$0xff]  ;;  %v132_v7 = vld [vmem:[%s1194_s1] sm:$0xff]  ;;  %s1033_s0 = smov 8   ;;  %vm76_vm4 = vcmask 130048   ;;  %vm30_vm5 = vcmask 220160  }
  0x15   :  { %53 = vperm.xlu1 %957, %v44_v1   ;;  %47 = vperm.xlu0 %956, %v42_v2   ;;  %v959_v5 = vld [vmem:[#allocation7] sm:$0xff]   ;;  %v134_v9 = vld [vmem:[%s1194_s1 + $0x10] sm:$0xff]  ;;  %v135_v10 = vld [vmem:[%s1194_s1 + $0x18] sm:$0xff]  ;;  %v41_v12 = vand.u32 127, %v40_v11  ;;  %33 = vst.msk [vmem:[#allocation2 + $0x10] sm:$0xff] %vm30_vm5, %v1032_v6  ;;  %vm152_vm6 = vcmask 64512  }
  0x16   :  { %874 = vmatprep.subr.bf16.mxu0 %v959_v5  ;;  %v133_v8 = vld [vmem:[%s1194_s1 + $0x8] sm:$0xff]  ;;  %31 = vst.msk [vmem:[#allocation2] sm:$0xff] %vm30_vm5, %v1032_v6  ;;  %32 = vst.msk [vmem:[#allocation2 + $0x8] sm:$0xff] %vm30_vm5, %v1032_v6  ;;  %s1034_s1 = smov 9   ;;  %v960_v33 = vld [vmem:[#allocation7 + $0x8] sm:$0xff]   ;;  %vm235_vm7 = vcmask 1044480  }
  0x17   :  { %875 = vmatpush3.bf16.msra.mxu0 %v959_v5  ;;  %34 = vst.msk [vmem:[#allocation2 + $0x18] sm:$0xff] %vm30_vm5, %v1032_v6  ;;  %v961_v34 = vld [vmem:[#allocation7 + $0x10] sm:$0x3f]   ;;  %vm236_vm8 = vcmask 1045504   ;;  %880 = vmatprep.subr.bf16.mxu1 %v960_v33  ;;  %v1035_v36 = vmov 65535   ;;  %s1036_s14 = smov 18  }
  0x18   :  { %888 = vmatprep.subr.bf16.mxu0 %v1032_v6  ;;  %v237_v37 = vsel %vm235_vm7, 4294967295, %v1035_v36  ;;  %881 = vmatpush3.bf16.msra.mxu1 %v960_v33  ;;  %vm173_vm9 = vcmask 146504   ;;  %vm178_vm10 = vcmask 72704   ;;  %vm180_vm11 = vcmask 71680   ;;  %v212_v56 = vld [vmem:[#allocation7 + $0x18] sm:$0x1] }
  0x19   :  { %56 = vperm.xlu1 %957, %v45_v3   ;;  %50 = vperm.xlu0 %956, %v43_v4   ;;  %v238_v38 = vsel %vm236_vm8, %v237_v37, 0  ;;  %vm188_vm12 = vcmask 220305   ;;  %vm190_vm13 = vcmask 220304   ;;  %vm35_vm14 = vcmask 392192   ;;  %s1038_s15 = smov 16   ;;  %s1039_s16 = smov 32  }
  0x1a   :  { %v240_v40 = vand.u32 %v961_v34, %v238_v38  ;;  %37 = vst.msk [vmem:[#allocation4 + $0x8] sm:$0xff] %vm35_vm14, %v1032_v6  ;;  %36 = vst.msk [vmem:[#allocation4] sm:$0xff] %vm35_vm14, %v1032_v6  ;;  %v215_v55 = vshrl.u32 %v40_v11, 7  ;;  %v213_v58 = vunpack.c.l.bf16 %v212_v56  ;;  %vm1037_vm15 = vmmov 0   ;;  %v964_v11 = vld [vmem:[#allocation7 + $0x30] sm:$0xff]   ;;  %v968_v38 = vld [vmem:[#allocation7 + $0x58] sm:$0xff]  }
  0x1b   :  { %vm421_vm7 = vcmask 523520   ;;  %vm423_vm8 = vcmask 256000   ;;  %s1041_s17 = smov [#allocation10]  }
  0x1c   :  { %882 = vmatprep.subr.bf16.mxu1 %v240_v40  ;;  %v1128_v57 = vsub.s32 0, %v215_v55  ;;  %s810_s18 = sshll.u32 %s1041_s17, 4  ;;  %s811_s18 = int_to_ptr.vmem [resolvable:$true] %s810_s18 }
  0x1d   :  { %140 = vrot.lane.b32.xlu0 %v132_v7, %s1033_s0  ;;  %142 = vrot.lane.b32.xlu1 %v133_v8, %s1033_s0  ;;  %s1002_s19 = scalar_lea.vmem %s811_s18, 32  ;;  %p1007_p9 = scmp.lt.s32.totalorder %s811_s18, %s811_s18 }
  0x1e   :  { %883 = vmatpush3.bf16.msra.mxu1 %v240_v40  ;;  %v217_v59 = vrot.slane %v213_v58, %v1128_v57  ;;  %v969_v40 = vld [vmem:[#allocation7 + $0x60] sm:$0xff]   ;;  %p1003_p8 = scmp.ne.s32.totalorder %s811_s18, %s1002_s19  ;;  %p1008_p10 = scmp.lt.s32.totalorder %s1002_s19, %s1002_s19 }
  0x1f   :  { %898 = vmatprep.subr.bf16.mxu1 %v1032_v6 }
  0x20   :  { %p1009_p11 = por %p1008_p10, %p1007_p9 }
  0x21   :  { %144 = vrot.lane.b32.xlu0 %v134_v9, %s1033_s0  ;;  %146 = vrot.lane.b32.xlu1 %v135_v10, %s1033_s0  ;;  %v962_v9 = vld [vmem:[#allocation7 + $0x20] sm:$0xff]   ;;  %v963_v10 = vld [vmem:[#allocation7 + $0x28] sm:$0xff]  }
  0x22   :  { %p1010_p12 = pnand %p1009_p11, %p1003_p8 }
  0x94   :  { %v54_v13 = vpop.permute.xlu1 %53  ;;  %v48_v14 = vpop.permute.xlu0 %47 }
  0x95   :  { %vm60_vm0 = vcmp.eq.s32.totalorder %v54_v13, %v41_v12  ;;  %vm58_vm1 = vcmp.eq.s32.totalorder %v48_v14, %v41_v12 }
  0x96   :  { %v64_v17 = vsel %vm60_vm0, 1.0, %v1032_v6  ;;  %v62_v18 = vsel %vm58_vm1, 1.0, %v1032_v6  ;;  %vm316_vm0 = vcmask 261248   ;;  %vm319_vm1 = vcmask 129024  }
  0x98   :  { %v57_v15 = vpop.permute.xlu1 %56  ;;  %v51_v16 = vpop.permute.xlu0 %50 }
  0x99   :  { %vm61_vm2 = vcmp.eq.s32.totalorder %v57_v15, %v41_v12  ;;  %vm59_vm3 = vcmp.eq.s32.totalorder %v51_v16, %v41_v12 }
  0x9a   :  { %v65_v19 = vsel %vm61_vm2, 1.0, %v1032_v6  ;;  %v63_v20 = vsel %vm59_vm3, 1.0, %v1032_v6  ;;  %vm324_vm2 = vcmask 392449   ;;  %vm410_vm3 = vcmask 261120  }
  0x9b   :  { %v67_v21 = vpack.c.bf16 %v65_v19, %v64_v17  ;;  %v66_v22 = vpack.c.bf16 %v63_v20, %v62_v18 }
  0x9c   :  { %v141_v23 = vpop.permute.xlu0 %140  ;;  %v143_v24 = vpop.permute.xlu1 %142 }
  0x9d   :  { %876 = vmatprep.mubr.msk.bf16.mxu0 %vm76_vm4, %v66_v22 }
  0x9e   :  { %877 = vmatmul.mubr.msk.bf16.vlgmr.msra.gmra.mrb[0].mxu0 %vm76_vm4, %v67_v21 }
  0x9f   :  { %889 = vmatpush3.bf16.msra.mxu0 %v962_v9  ;;  %894 = vmatprep.mubr.msk.bf16.mxu0 %vm1037_vm15, %v1032_v6 }
  0xa0   :  { %v145_v25 = vpop.permute.xlu0 %144  ;;  %v147_v27 = vpop.permute.xlu1 %146  ;;  %890 = vmatprep.subr.bf16.mxu0 %v1032_v6 }
  0xa3   :  { %891 = vmatpush3.bf16.msra.mxu0 %v963_v10  ;;  %v604_v10 = vld [vmem:[#allocation7 + $0x98] sm:$0x1] }
  0xa4   :  { %892 = vmatprep.subr.bf16.mxu0 %v1032_v6 }
  0xa7   :  { %893 = vmatpush3.bf16.msra.mxu0 %v964_v11  ;;  %v605_v11 = vunpack.c.l.bf16 %v604_v10 }
  0xa8   :  { %914 = vmatprep.subr.bf16.mxu0 %v1032_v6 }
 0x171   :  { %v878_v26 = vpop.f32.mrb[0].mxu0 }
 0x172   :  { %v117_v28 = vpop.f32.mrb[1].mxu0  ;;  %v155_v29 = vsel %vm152_vm6, %v878_v26, %v145_v25  ;;  %v965_v25 = vld [vmem:[#allocation7 + $0x40] sm:$0xff]   ;;  %v966_v26 = vld [vmem:[#allocation7 + $0x48] sm:$0xff]  }
 0x173   :  { %v879_v30 = vpop.f32.mrb[2].mxu0  ;;  %165 = vrot.lane.b32.xlu0 %v155_v29, %s1034_s1  ;;  %v153_v35 = vsel %vm152_vm6, %v117_v28, %v141_v23  ;;  %v340_v28 = vld [vmem:[#allocation7 + $0x38] sm:$0x1] }
 0x174   :  { %v120_v31 = vpop.f32.mrb[3].mxu0  ;;  %v156_v32 = vsel %vm152_vm6, %v879_v30, %v147_v27  ;;  %v967_v27 = vld [vmem:[#allocation7 + $0x50] sm:$0xff]  }
 0x175   :  { %167 = vrot.lane.b32.xlu1 %v156_v32, %s1034_s1  ;;  %v154_v39 = vsel %vm152_vm6, %v120_v31, %v143_v24 }
 0x177   :  { %161 = vrot.lane.b32.xlu0 %v153_v35, %s1034_s1 }
 0x179   :  { %163 = vrot.lane.b32.xlu1 %v154_v39, %s1034_s1 }
 0x17b   :  { %182 = vrot.lane.b32.xlu0 %v153_v35, %s1036_s14 }
 0x17d   :  { %184 = vrot.lane.b32.xlu1 %v154_v39, %s1036_s14 }
 0x17f   :  { %194 = vrot.lane.b32.xlu0 %v155_v29, %s1036_s14 }
 0x181   :  { %196 = vrot.lane.b32.xlu1 %v156_v32, %s1036_s14 }
 0x1e5   :  { %v166_v41 = vpop.permute.xlu0 %165 }
 0x1e6   :  { %176 = vst.msk [vmem:[#allocation2 + $0x10] sm:$0xff] %vm173_vm9, %v166_v41  ;;  %v970_v41 = vld [vmem:[#allocation7 + $0x68] sm:$0xff]  }
 0x1e7   :  { %v168_v42 = vpop.permute.xlu1 %167 }
 0x1e8   :  { %177 = vst.msk [vmem:[#allocation2 + $0x18] sm:$0xff] %vm173_vm9, %v168_v42 }
 0x1e9   :  { %192 = vst.msk [vmem:[#allocation2 + $0x11] sm:$0xff] %vm178_vm10, %v155_v29  ;;  %v162_v43 = vpop.permute.xlu0 %161  ;;  %v341_v29 = vunpack.c.l.bf16 %v340_v28 }
 0x1ea   :  { %193 = vst.msk [vmem:[#allocation2 + $0x19] sm:$0x7f] %vm180_vm11, %v156_v32 }
 0x1eb   :  { %174 = vst.msk [vmem:[#allocation2] sm:$0xff] %vm173_vm9, %v162_v43  ;;  %v164_v44 = vpop.permute.xlu1 %163  ;;  %v345_v30 = vrot.slane %v341_v29, %v1128_v57 }
 0x1ec   :  { %175 = vst.msk [vmem:[#allocation2 + $0x8] sm:$0xff] %vm173_vm9, %v164_v44  ;;  %vm430_vm9 = vcmask 260100  }
 0x1ed   :  { %179 = vst.msk [vmem:[#allocation2 + $0x1] sm:$0xff] %vm178_vm10, %v153_v35  ;;  %v183_v45 = vpop.permute.xlu0 %182  ;;  %vm428_vm10 = vcmask 781825  }
 0x1ee   :  { %181 = vst.msk [vmem:[#allocation2 + $0x9] sm:$0x7f] %vm180_vm11, %v154_v39  ;;  %vm432_vm11 = vcmask 785925  }
 0x1ef   :  { %189 = vst.msk [vmem:[#allocation2 - $0x1] sm:$0xfe] %vm188_vm12, %v183_v45  ;;  %v185_v46 = vpop.permute.xlu1 %184 }
 0x1f0   :  { %191 = vst.msk [vmem:[#allocation2 + $0x7] sm:$0xff] %vm190_vm13, %v185_v46 }
 0x1f1   :  { %v195_v47 = vpop.permute.xlu0 %194 }
 0x1f2   :  { %200 = vst.msk [vmem:[#allocation2 + $0xf] sm:$0xfe] %vm188_vm12, %v195_v47  ;;  %vm659_vm12 = vcmask 7168  }
 0x1f3   :  { %v197_v48 = vpop.permute.xlu1 %196 }
 0x1f4   :  { %201 = vst.msk [vmem:[#allocation2 + $0x17] sm:$0xff] %vm190_vm13, %v197_v48 }
 0x1f7   :  { %v202_v49 = vld [vmem:[#allocation2] sm:$0xff]  ;;  %v203_v50 = vld [vmem:[#allocation2 + $0x8] sm:$0xff] }
 0x1f8   :  { %v206_v51 = vpack.c.bf16 %v203_v50, %v202_v49  ;;  %v971_v49 = vld [vmem:[#allocation7 + $0x78] sm:$0xff]   ;;  %v972_v50 = vld [vmem:[#allocation7 + $0x80] sm:$0xff]  }
 0x1fa   :  { %884 = vmatprep.mubr.msk.bf16.mxu1 %vm30_vm5, %v206_v51  ;;  %v448_v51 = vld [vmem:[#allocation7 + $0x70] sm:$0x1] }
 0x1fb   :  { %v204_v52 = vld [vmem:[#allocation2 + $0x10] sm:$0xff]  ;;  %v205_v53 = vld [vmem:[#allocation2 + $0x18] sm:$0xff] }
 0x1fc   :  { %v207_v54 = vpack.c.bf16 %v205_v53, %v204_v52  ;;  %v449_v52 = vunpack.c.l.bf16 %v448_v51 }
 0x1fe   :  { %885 = vmatmul.mubr.msk.bf16.vlgmr.msra.gmra.mrb[0].mxu1 %vm30_vm5, %v207_v54  ;;  %vm38_vm5 = vcmask 785408   ;;  %v453_v53 = vrot.slane %v449_v52, %v1128_v57 }
 0x1ff   :  { %910 = vmatprep.mubr.msk.bf16.mxu1 %vm1037_vm15, %v1032_v6  ;;  %899 = vmatpush3.bf16.msra.mxu1 %v965_v25  ;;  %39 = vst.msk [vmem:[#allocation6] sm:$0xff] %vm38_vm5, %v1032_v6 }
 0x200   :  { %900 = vmatprep.subr.bf16.mxu1 %v1032_v6 }
 0x203   :  { %901 = vmatpush3.bf16.msra.mxu1 %v966_v26 }
 0x204   :  { %902 = vmatprep.subr.bf16.mxu1 %v1032_v6 }
 0x207   :  { %903 = vmatpush3.bf16.msra.mxu1 %v967_v27 }
 0x208   :  { %904 = vmatprep.subr.bf16.mxu1 %v1032_v6 }
 0x20b   :  { %905 = vmatpush3.bf16.msra.mxu1 %v968_v38 }
 0x20c   :  { %906 = vmatprep.subr.bf16.mxu1 %v1032_v6 }
 0x20f   :  { %907 = vmatpush3.bf16.msra.mxu1 %v969_v40 }
 0x210   :  { %908 = vmatprep.subr.bf16.mxu1 %v1032_v6 }
 0x213   :  { %909 = vmatpush3.bf16.msra.mxu1 %v970_v41 }
 0x214   :  { %934 = vmatprep.subr.bf16.mxu1 %v1032_v6 }
 0x2d1   :  { %v886_v60 = vpop.f32.mrb[0].mxu1 }
 0x2d2   :  { %v285_v61 = vadd.f32 %v886_v60, %v217_v59  ;;  %v276_v62 = vpop.f32.mrb[1].mxu1 }
 0x2d3   :  { %v277_v63 = vadd.f32 %v276_v62, %v217_v59  ;;  %v887_v0 = vpop.f32.mrb[2].mxu1  ;;  %v973_v62 = vld [vmem:[#allocation7 + $0x90] sm:$0xff]  }
 0x2d4   :  { %v293_v1 = vmax.f32 %v285_v61, 0.0  ;;  %v288_v2 = vadd.f32 %v887_v0, %v217_v59  ;;  %v279_v3 = vpop.f32.mrb[3].mxu1 }
 0x2d5   :  { %v291_v4 = vmax.f32 %v277_v63, 0.0  ;;  %v280_v5 = vadd.f32 %v279_v3, %v217_v59  ;;  %v539_v63 = vld [vmem:[#allocation7 + $0x88] sm:$0x1] }
 0x2d6   :  { %297 = vst.msk [vmem:[#allocation3 + $0x10] sm:$0xff] %vm76_vm4, %v293_v1  ;;  %v294_v7 = vmax.f32 %v288_v2, 0.0  ;;  %v540_v0 = vunpack.c.l.bf16 %v539_v63 }
 0x2d7   :  { %295 = vst.msk [vmem:[#allocation3] sm:$0xff] %vm76_vm4, %v291_v4  ;;  %v292_v8 = vmax.f32 %v280_v5, 0.0 }
 0x2d8   :  { %298 = vst.msk [vmem:[#allocation3 + $0x18] sm:$0xff] %vm76_vm4, %v294_v7  ;;  %v544_v1 = vrot.slane %v540_v0, %v1128_v57 }
 0x2d9   :  { %296 = vst.msk [vmem:[#allocation3 + $0x8] sm:$0xff] %vm76_vm4, %v292_v8 }
 0x2df   :  { %v301_v12 = vld [vmem:[#allocation3 + $0x10] ss:$2 sm:$0xff]  ;;  %v305_v13 = vld [vmem:[#allocation3 + $0x11] ss:$2 sm:$0xff] }
 0x2e0   :  { %v307_v14 = vmax.f32 %v301_v12, %v305_v13  ;;  %v299_v15 = vld [vmem:[#allocation3] ss:$2 sm:$0xff]  ;;  %v303_v16 = vld [vmem:[#allocation3 + $0x1] ss:$2 sm:$0xff]  ;;  %v609_v12 = vrot.slane %v605_v11, %v1128_v57 }
 0x2e1   :  { %v306_v17 = vmax.f32 %v299_v15, %v303_v16 }
 0x2e2   :  { %312 = vrot.lane.b32.xlu1 %v307_v14, %s1038_s15 }
 0x2e3   :  { %310 = vrot.lane.b32.xlu0 %v306_v17, %s1038_s15 }
 0x2e6   :  { %327 = vrot.lane.b32.xlu1 %v307_v14, %s1039_s16 }
 0x2e7   :  { %321 = vrot.lane.b32.xlu0 %v306_v17, %s1039_s16 }
 0x354   :  { %v313_v18 = vpop.permute.xlu1 %312 }
 0x355   :  { %318 = vst.msk [vmem:[#allocation4 + $0x8] sm:$0xff] %vm316_vm0, %v313_v18  ;;  %v311_v19 = vpop.permute.xlu0 %310 }
 0x356   :  { %326 = vst.msk [vmem:[#allocation4 + $0x9] sm:$0x7f] %vm319_vm1, %v307_v14 }
 0x357   :  { %317 = vst.msk [vmem:[#allocation4] sm:$0xff] %vm316_vm0, %v311_v19 }
 0x358   :  { %320 = vst.msk [vmem:[#allocation4 + $0x1] sm:$0x7f] %vm319_vm1, %v306_v17  ;;  %v328_v20 = vpop.permute.xlu1 %327 }
 0x359   :  { %330 = vst.msk [vmem:[#allocation4 + $0x7] sm:$0xfe] %vm324_vm2, %v328_v20  ;;  %v322_v21 = vpop.permute.xlu0 %321 }
 0x35a   :  { %325 = vst.msk [vmem:[#allocation4 - $0x1] sm:$0xfe] %vm324_vm2, %v322_v21 }
 0x360   :  { %v332_v22 = vld [vmem:[#allocation4 + $0x8] sm:$0xff] }
 0x361   :  { %v331_v23 = vld [vmem:[#allocation4] sm:$0xff] }
 0x362   :  { %v333_v24 = vpack.c.bf16 %v332_v22, %v331_v23 }
 0x364   :  { %895 = vmatmul.mubr.msk.bf16.vlgmr.msra.gmra.mrb[4].mxu0 %vm35_vm14, %v333_v24 }
 0x365   :  { %918 = vmatprep.mubr.msk.bf16.mxu0 %vm1037_vm15, %v1032_v6  ;;  %915 = vmatpush3.bf16.msra.mxu0 %v971_v49 }
 0x366   :  { %916 = vmatprep.subr.bf16.mxu0 %v1032_v6 }
 0x369   :  { %917 = vmatpush3.bf16.msra.mxu0 %v972_v50 }
 0x36a   :  { %922 = vmatprep.subr.bf16.mxu0 %v1032_v6 }
 0x437   :  { %v401_v31 = vpop.f32.mrb[4].mxu0 }
 0x438   :  { %v402_v32 = vadd.f32 %v401_v31, %v345_v30  ;;  %v896_v33 = vpop.f32.mrb[5].mxu0 }
 0x439   :  { %v404_v34 = vpop.f32.mrb[6].mxu0 }
 0x43a   :  { %v408_v35 = vmax.f32 %v402_v32, 0.0  ;;  %v405_v36 = vadd.f32 %v404_v34, %v345_v30  ;;  %v897_v37 = vpop.f32.mrb[7].mxu0  ;;  %v670_v34 = vld [vmem:[#allocation7 + $0xb8] sm:$0x1] }
 0x43c   :  { %411 = vst.msk [vmem:[#allocation5] sm:$0xff] %vm410_vm3, %v408_v35  ;;  %v409_v39 = vmax.f32 %v405_v36, 0.0  ;;  %v1040_v35 = vmov 32   ;;  %v974_v36 = vld [vmem:[#allocation7 + $0xa0] sm:$0xff]  }
 0x43e   :  { %412 = vst.msk [vmem:[#allocation5 + $0x8] sm:$0xff] %vm410_vm3, %v409_v39 }
 0x445   :  { %v413_v42 = vld [vmem:[#allocation5] ss:$2 sm:$0xff]  ;;  %v415_v43 = vld [vmem:[#allocation5 + $0x1] ss:$2 sm:$0xff] }
 0x446   :  { %v416_v44 = vmax.f32 %v413_v42, %v415_v43  ;;  %v975_v42 = vld [vmem:[#allocation7 + $0xa8] sm:$0xff]  }
 0x448   :  { %425 = vrot.lane.b32.xlu1 %v416_v44, %s1029_s22  ;;  %418 = vrot.lane.b32.xlu0 %v416_v44, %s1039_s16 }
 0x4ba   :  { %v419_v45 = vpop.permute.xlu0 %418  ;;  %v426_v46 = vpop.permute.xlu1 %425 }
 0x4bb   :  { %422 = vst.msk [vmem:[#allocation6] sm:$0xff] %vm421_vm7, %v419_v45 }
 0x4bc   :  { %424 = vst.msk [vmem:[#allocation6 + $0x1] sm:$0x7] %vm423_vm8, %v416_v44 }
 0x4bd   :  { %431 = vst.msk [vmem:[#allocation6 + $0x1] sm:$0x70] %vm430_vm9, %v416_v44 }
 0x4be   :  { %429 = vst.msk [vmem:[#allocation6 - $0x1] sm:$0xe] %vm428_vm10, %v426_v46 }
 0x4bf   :  { %433 = vst.msk [vmem:[#allocation6 - $0x1] sm:$0xe0] %vm432_vm11, %v426_v46  ;;  %v741_v46 = vld [vmem:[#allocation7 + $0xb0] sm:$0x1] }
 0x4c6   :  { %v434_v47 = vld [vmem:[#allocation6] sm:$0xff] }
 0x4c7   :  { %v435_v48 = vpack.c.bf16 %v434_v47, %v434_v47  ;;  %v742_v47 = vunpack.c.l.bf16 %v741_v46 }
 0x4c9   :  { %911 = vmatmul.mubr.msk.bf16.vlgmr.msra.gmra.mrb[4].mxu1 %vm38_vm5, %v435_v48  ;;  %v746_v48 = vrot.slane %v742_v47, %v1128_v57 }
 0x4ca   :  { %938 = vmatprep.mubr.msk.bf16.mxu1 %vm1037_vm15, %v1032_v6  ;;  %935 = vmatpush3.bf16.msra.mxu1 %v974_v36 }
 0x4cb   :  { %936 = vmatprep.subr.bf16.mxu1 %v1032_v6 }
 0x4ce   :  { %937 = vmatpush3.bf16.msra.mxu1 %v975_v42 }
 0x59c   :  { %v527_v54 = vpop.f32.mrb[4].mxu1 }
 0x59d   :  { %v528_v55 = vadd.f32 %v527_v54, %v453_v53  ;;  %v912_v56 = vpop.f32.mrb[5].mxu1 }
 0x59e   :  { %v530_v58 = vpop.f32.mrb[6].mxu1 }
 0x59f   :  { %v533_v59 = vmax.f32 %v528_v55, 0.0  ;;  %v913_v60 = vpop.f32.mrb[7].mxu1 }
 0x5a1   :  { %v534_v61 = vpack.c.bf16 %v533_v59, %v533_v59 }
 0x5a3   :  { %919 = vmatmul.mubr.msk.bf16.vlgmr.msra.gmra.mrb[8].mxu0 %vm410_vm3, %v534_v61 }
 0x5a4   :  { %924 = vmatprep.mubr.msk.bf16.mxu0 %vm1037_vm15, %v1032_v6  ;;  %923 = vmatpush3.bf16.msra.mxu0 %v973_v62 }
 0x5a5   :  { %928 = vmatprep.subr.bf16.mxu0 %v1032_v6 }
 0x676   :  { %v594_v2 = vpop.f32.mrb[8].mxu0 }
 0x677   :  { %v595_v3 = vadd.f32 %v594_v2, %v544_v1  ;;  %v920_v4 = vpop.f32.mrb[9].mxu0 }
 0x678   :  { %v597_v5 = vpop.f32.mrb[10].mxu0 }
 0x679   :  { %v600_v7 = vmax.f32 %v595_v3, 0.0  ;;  %v921_v8 = vpop.f32.mrb[11].mxu0 }
 0x67b   :  { %v601_v9 = vpack.c.bf16 %v600_v7, %v600_v7 }
 0x67d   :  { %925 = vmatmul.mubr.msk.bf16.vlgmr.msra.gmra.mrb[12].mxu0 %vm76_vm4, %v601_v9  ;;  %vm685_vm4 = vcmask 1043456  }
 0x67e   :  { %930 = vmatprep.mubr.msk.bf16.mxu0 %vm1037_vm15, %v1032_v6 }
 0x750   :  { %v653_v13 = vpop.f32.mrb[12].mxu0 }
 0x751   :  { %v654_v14 = vadd.f32 %v653_v13, %v609_v12  ;;  %v926_v15 = vpop.f32.mrb[13].mxu0 }
 0x752   :  { %v656_v16 = vpop.f32.mrb[14].mxu0 }
 0x753   :  { %v660_v17 = vsel %vm659_vm12, %v654_v14, -inf  ;;  %v927_v18 = vpop.f32.mrb[15].mxu0 }
 0x754   :  { %v661_v19 = vrot.slane %v660_v17, 4 }
 0x756   :  { %v662_v20 = vmax.f32 %v660_v17, %v661_v19 }
 0x758   :  { %v663_v21 = vrot.slane %v662_v20, 2 }
 0x75a   :  { %v664_v22 = vmax.f32 %v662_v20, %v663_v21 }
 0x75c   :  { %v665_v23 = vrot.slane %v664_v22, 1 }
 0x75e   :  { %v666_v24 = vmax.f32 %v664_v22, %v665_v23 }
 0x760   :  { %v667_v25 = vsub.f32 %v654_v14, %v666_v24 }
 0x762   :  { %v668_v26 = vmul.f32 1.442695, %v667_v25 }
 0x764   :  { %976 = vpow2.f32 %v668_v26 }
 0x76e   :  { %v977_v27 = vpop.eup %976 }
 0x76f   :  { %677 = vrot.lane.b32.xlu1 %v977_v27, %s1039_s16  ;;  %673 = vperm.xlu0 %956, %v977_v27  }
 0x773   :  { %958 = vset.pattern.permute.xlu0 %v1040_v35 }
 0x7e1   :  { %v678_v30 = vpop.permute.xlu1 %677 }
 0x7ee   :  { %v674_v28 = vpop.permute.xlu0 %673 }
 0x7ef   :  { %v676_v29 = vmul.f32 %v674_v28, %v533_v59 }
 0x7f1   :  { %v680_v31 = vsel %vm410_vm3, %v676_v29, %v678_v30 }
 0x7f2   :  { %v681_v32 = vpack.c.bf16 %v680_v31, %v680_v31 }
 0x7f4   :  { %v687_v33 = vsel %vm685_vm4, %v681_v32, 0 }
 0x7f5   :  { %929 = vmatpush3.bf16.msra.mxu0 %v687_v33 }
 0x7f8   :  { %931 = vmatmul.mubr.msk.bf16.vlgmr.msra.gmra.mrb[16].mxu0 %vm152_vm6, %v670_v34  ;;  %vm802_vm6 = vcmask 25600  }
 0x8cb   :  { %v723_v37 = vpop.f32.mrb[16].mxu0 }
 0x8cc   :  { %978 = vrcp.f32 %v723_v37  ;;  %v932_v38 = vpop.f32.mrb[17].mxu0 }
 0x8cd   :  { %v726_v39 = vpop.f32.mrb[18].mxu0 }
 0x8ce   :  { %v933_v40 = vpop.f32.mrb[19].mxu0 }
 0x8d6   :  { %v979_v41 = vpop.eup %978 }
 0x8d7   :  { %732 = vperm.xlu0 %958, %v979_v41  }
 0x956   :  { %v733_v43 = vpop.permute.xlu0 %732 }
 0x957   :  { %v735_v44 = vmul.f32 %v733_v43, %v723_v37 }
 0x959   :  { %v736_v45 = vpack.c.bf16 %v735_v44, %v735_v44 }
 0x95b   :  { %939 = vmatmul.mubr.msk.bf16.vlgmr.msra.gmra.mrb[8].mxu1 %vm410_vm3, %v736_v45 }
 0xa2e   :  { %v796_v6 = vpop.f32.mrb[8].mxu1 }
 0xa2f   :  { %v797_v49 = vadd.f32 %v796_v6, %v746_v48  ;;  %v940_v50 = vpop.f32.mrb[9].mxu1 }
 0xa30   :  { %v799_v51 = vpop.f32.mrb[10].mxu1 }
 0xa31   :  { %v941_v52 = vpop.f32.mrb[11].mxu1  ;;  %803 = vst.msk [vmem:[#allocation10] sm:$0x3] %vm802_vm6, %v797_v49 }
 0xa32   :  { %1013 = shalt.err (!%p1010_p12)
}
 0xa33   :  { %s1014_s22 = scalar_lea.hbm %s1196_s3, 32 }
 0xa34   :  { %p1015_p13 = scmp.ne.s32.totalorder %s1196_s3, %s1014_s22  ;;  %p1018_p0 = scmp.lt.u32.totalorder %s1014_s22, %s1196_s3 }
 0xa36   :  { %p1020_p1 = pnand %p1018_p0, %p1015_p13 }
 0xa38   :  { %1023 = shalt.err (!%p1020_p1)
}
 0xa39   :  { %813 = dma.vmem_to_hbm [thread:$0]  %s811_s18, 32, %s1196_s3, [#allocation9]  }
 0xa3a   :  { %1026 = dma.done.wait [#allocation9], 32  }
 0xa3b   :  { %1027 = vsyncadd [#allocation9], 4294967264 }
 0xa3c   :  { %817 = vsyncpa [#allocation8], 1 }
 0xa3d   :  { %818 = vsyncpa [#allocation9], 1 }

</bundles_post_ra>
